<compile_context>
chip_gen: v7x
topology: tpu7x:2x2x1
jax: 0.10.0
libtpu: 0.0.40
codegen_flags: <defaults>
</compile_context>

<pallas_src>
import functools

import jax
import jax.numpy as jnp
from jax.experimental import pallas as pl
from jax.experimental.pallas import tpu as pltpu


def _simple_model_kernel(x_ref, w1_ref, b1_ref, w2_ref, b2_ref, out_ref, *, batch_rows):
    # x: (TB, 512), w1: (512, 64), b1: (1, 64), w2: (1, 64), b2: (1, 1), out: (1, 1)
    step = pl.program_id(0)

    @pl.when(step == 0)
    def _init():
        out_ref[...] = jnp.zeros_like(out_ref)

    # linear1 on the MXU (no bias yet), then fold linear2 + global sum into a
    # VPU multiply-reduce instead of an N=1 matmul.
    h = jnp.dot(x_ref[...], w1_ref[...], preferred_element_type=jnp.float32)
    out_ref[...] += jnp.sum(h * w2_ref[...], keepdims=True)

    @pl.when(step == pl.num_programs(0) - 1)
    def _finalize():
        # Total bias contribution of the whole (true) batch:  B * (b1 . w2 + b2)
        bias = jnp.sum(b1_ref[...] * w2_ref[...], keepdims=True) + b2_ref[...]
        out_ref[...] += jnp.float32(batch_rows) * bias


def simple_model_forward(x, w1, b1, w2, b2, *, tb=512):
    """x: (B, 512). Returns scalar f32 == sum(linear2(linear1(x)))."""
    B, d_in = x.shape
    d_h = w1.shape[1]

    # Tile rows: multiple of 8 (sublane constraint), multiple of 256 by default
    # (full MXU passes on v6e/v7x), capped at the (padded) batch size.
    tb = min(tb, max(8, ((B + 7) // 8) * 8))
    padded_b = ((B + tb - 1) // tb) * tb
    if padded_b != B:
        # zero rows contribute 0 to sum((x@W1)*w2); biases use the true B.
        x = jnp.pad(x, ((0, padded_b - B), (0, 0)))
    num_tiles = padded_b // tb

    w2_row = w2.reshape(1, d_h)  # (1, 64) lane vector for the VPU reduce
    b1_row = b1.reshape(1, d_h)
    b2_2d = b2.reshape(1, 1)

    kernel = functools.partial(_simple_model_kernel, batch_rows=B)

    out = pl.pallas_call(
        kernel,
        out_shape=jax.ShapeDtypeStruct((1, 1), jnp.float32),
        grid_spec=pltpu.PrefetchScalarGridSpec(
            num_scalar_prefetch=0,
            grid=(num_tiles,),
            in_specs=[
                pl.BlockSpec((tb, d_in), lambda i: (i, 0)),   # streamed batch tiles
                pl.BlockSpec((d_in, d_h), lambda i: (0, 0)),  # W1 resident
                pl.BlockSpec((1, d_h), lambda i: (0, 0)),     # b1 resident
                pl.BlockSpec((1, d_h), lambda i: (0, 0)),     # w2 (as row) resident
                pl.BlockSpec((1, 1), lambda i: (0, 0)),       # b2 resident
            ],
            out_specs=pl.BlockSpec((1, 1), lambda i: (0, 0)),  # resident accumulator
        ),
        compiler_params=pltpu.CompilerParams(
            dimension_semantics=("arbitrary",),  # batch axis is a reduction here
        ),
    )(x, w1, b1_row, w2_row, b2_2d)
    # TODO(synk): for very large B on v7x, add a leading "parallel" axis with
    # per-core partial sums to use both TensorCores.
    return out[0, 0]


def init_params(key):
    """Deterministic init matching nn.Linear shapes: (512->64), (64->1)."""
    k1, k2, k3, k4 = jax.random.split(key, 4)
    # PyTorch Linear stores weight as (out, in); we store transposed (in, out)
    # so the kernel computes x @ W directly.
    bound1 = 1.0 / (512.0 ** 0.5)
    w1 = jax.random.uniform(k1, (512, 64), jnp.float32, -bound1, bound1)
    b1 = jax.random.uniform(k2, (64,), jnp.float32, -bound1, bound1)
    bound2 = 1.0 / (64.0 ** 0.5)
    w2 = jax.random.uniform(k3, (64, 1), jnp.float32, -bound2, bound2)
    b2 = jax.random.uniform(k4, (1,), jnp.float32, -bound2, bound2)
    return w1, b1, w2, b2


def _reference(x, w1, b1, w2, b2):
    return jnp.sum((x @ w1 + b1) @ w2 + b2)


if __name__ == "__main__":
    key = jax.random.PRNGKey(0)
    kx, kx2, kp = jax.random.split(key, 3)
    w1, b1, w2, b2 = init_params(kp)

    # Small single-tile case.
    B = 8
    x = jax.random.normal(kx, (B, 512), jnp.float32)
    out = simple_model_forward(x, w1, b1, w2, b2)
    jax.block_until_ready(out)
    ref = _reference(x, w1, b1, w2, b2)
    assert jnp.allclose(out, ref, rtol=1e-4, atol=1e-4), (out, ref)

    # Multi-tile case (exercises the grid accumulator: 3 tiles of 8 rows).
    B2 = 24
    x2 = jax.random.normal(kx2, (B2, 512), jnp.float32)
    out2 = simple_model_forward(x2, w1, b1, w2, b2, tb=8)
    jax.block_until_ready(out2)
    ref2 = _reference(x2, w1, b1, w2, b2)
    assert jnp.allclose(out2, ref2, rtol=1e-4, atol=1e-4), (out2, ref2)

    print("KERNEL_OK")
</pallas_src>

<mosaic_0001>
module attributes {stable_mosaic.version = 11 : i64} {
  func.func @_simple_model_kernel(%arg0: i32, %arg1: memref<8x512xf32, #tpu.memory_space<vmem>>, %arg2: memref<512x64xf32, #tpu.memory_space<vmem>>, %arg3: memref<1x64xf32, #tpu.memory_space<vmem>>, %arg4: memref<1x64xf32, #tpu.memory_space<vmem>>, %arg5: memref<1x1xf32, #tpu.memory_space<vmem>>, %arg6: memref<1x1xf32, #tpu.memory_space<vmem>>) attributes {dimension_semantics = [#tpu.dimension_semantics<arbitrary>], iteration_bounds = array<i64: 1>, scalar_prefetch = 0 : i64, scratch_operands = 0 : i64, tpu.core_type = #tpu.core_type<tc>, window_params = [{transform_indices = @transform_0, window_bounds = array<i64: 8, 512>}, {pipeline_mode = #tpu.pipeline_mode<synchronous>, transform_indices = @transform_1, window_bounds = array<i64: 512, 64>}, {pipeline_mode = #tpu.pipeline_mode<synchronous>, transform_indices = @transform_2, window_bounds = array<i64: 1, 64>}, {pipeline_mode = #tpu.pipeline_mode<synchronous>, transform_indices = @transform_3, window_bounds = array<i64: 1, 64>}, {pipeline_mode = #tpu.pipeline_mode<synchronous>, transform_indices = @transform_4, window_bounds = array<i64: 1, 1>}, {pipeline_mode = #tpu.pipeline_mode<synchronous>, transform_indices = @transform_5, window_bounds = array<i64: 1, 1>}]} {
    %c0_i32 = arith.constant 0 : i32
    %0 = arith.cmpi eq, %arg0, %c0_i32 : i32
    %1 = arith.extui %0 : i1 to i32
    %c0_i32_0 = arith.constant 0 : i32
    %2 = arith.cmpi ne, %1, %c0_i32_0 : i32
    scf.if %2 {
      %cst_13 = arith.constant 0.000000e+00 : f32
      %20 = vector.broadcast %cst_13 : f32 to vector<1x1xf32>
      %c0_14 = arith.constant 0 : index
      %c0_15 = arith.constant 0 : index
      %21 = vector.load %arg6[%c0_14, %c0_15] : memref<1x1xf32, #tpu.memory_space<vmem>>, vector<1x1xf32>
      tpu.vector_store %arg6[%c0_14, %c0_15], %20 {strides = array<i32>} : memref<1x1xf32, #tpu.memory_space<vmem>>, vector<1x1xf32>,
    } else {
    }
    %c0 = arith.constant 0 : index
    %c0_1 = arith.constant 0 : index
    %3 = vector.load %arg1[%c0, %c0_1] : memref<8x512xf32, #tpu.memory_space<vmem>>, vector<8x512xf32>
    %c0_2 = arith.constant 0 : index
    %c0_3 = arith.constant 0 : index
    %4 = vector.load %arg2[%c0_2, %c0_3] : memref<512x64xf32, #tpu.memory_space<vmem>>, vector<512x64xf32>
    %cst = arith.constant dense<0.000000e+00> : vector<8x64xf32>
    %5 = tpu.matmul %3, %4, %cst {dimension_numbers = #tpu.dot_dimension_numbers<[1], [0], [0], [1], [0, 0, 1, 1], [], []>} : vector<8x512xf32>, vector<512x64xf32>, vector<8x64xf32> -> vector<8x64xf32>
    %c0_4 = arith.constant 0 : index
    %c0_5 = arith.constant 0 : index
    %6 = vector.load %arg6[%c0_4, %c0_5] : memref<1x1xf32, #tpu.memory_space<vmem>>, vector<1x1xf32>
    %c0_6 = arith.constant 0 : index
    %c0_7 = arith.constant 0 : index
    %7 = vector.load %arg4[%c0_6, %c0_7] : memref<1x64xf32, #tpu.memory_space<vmem>>, vector<1x64xf32>
    %8 = vector.broadcast %7 : vector<1x64xf32> to vector<8x64xf32>
    %9 = arith.mulf %5, %8 : vector<8x64xf32>
    %10 = vector.shape_cast %9 : vector<8x64xf32> to vector<1x8x64xf32>
    %cst_8 = arith.constant dense<0.000000e+00> : vector<1xf32>
    %11 = vector.multi_reduction <add>, %10, %cst_8 [1, 2] : vector<1x8x64xf32> to vector<1xf32>
    %12 = vector.shape_cast %11 : vector<1xf32> to vector<1x1x1xf32>
    %13 = vector.extract %12[0, 0, 0] : f32 from vector<1x1x1xf32>
    %14 = vector.broadcast %13 : f32 to vector<1x1xf32>
    %15 = arith.addf %6, %14 : vector<1x1xf32>
    %c0_9 = arith.constant 0 : index
    %c0_10 = arith.constant 0 : index
    %16 = vector.load %arg6[%c0_9, %c0_10] : memref<1x1xf32, #tpu.memory_space<vmem>>, vector<1x1xf32>
    tpu.vector_store %arg6[%c0_9, %c0_10], %15 {strides = array<i32>} : memref<1x1xf32, #tpu.memory_space<vmem>>, vector<1x1xf32>,
    %c0_i32_11 = arith.constant 0 : i32
    %17 = arith.cmpi eq, %arg0, %c0_i32_11 : i32
    %18 = arith.extui %17 : i1 to i32
    %c0_i32_12 = arith.constant 0 : i32
    %19 = arith.cmpi ne, %18, %c0_i32_12 : i32
    scf.if %19 {
      %c0_13 = arith.constant 0 : index
      %c0_14 = arith.constant 0 : index
      %20 = vector.load %arg3[%c0_13, %c0_14] : memref<1x64xf32, #tpu.memory_space<vmem>>, vector<1x64xf32>
      %c0_15 = arith.constant 0 : index
      %c0_16 = arith.constant 0 : index
      %21 = vector.load %arg4[%c0_15, %c0_16] : memref<1x64xf32, #tpu.memory_space<vmem>>, vector<1x64xf32>
      %22 = arith.mulf %20, %21 : vector<1x64xf32>
      %23 = vector.shape_cast %22 : vector<1x64xf32> to vector<1x1x64xf32>
      %cst_17 = arith.constant dense<0.000000e+00> : vector<1xf32>
      %24 = vector.multi_reduction <add>, %23, %cst_17 [1, 2] : vector<1x1x64xf32> to vector<1xf32>
      %25 = vector.shape_cast %24 : vector<1xf32> to vector<1x1x1xf32>
      %26 = vector.extract %25[0, 0, 0] : f32 from vector<1x1x1xf32>
      %27 = vector.broadcast %26 : f32 to vector<1x1xf32>
      %c0_18 = arith.constant 0 : index
      %c0_19 = arith.constant 0 : index
      %28 = vector.load %arg5[%c0_18, %c0_19] : memref<1x1xf32, #tpu.memory_space<vmem>>, vector<1x1xf32>
      %29 = arith.addf %27, %28 : vector<1x1xf32>
      %c0_20 = arith.constant 0 : index
      %c0_21 = arith.constant 0 : index
      %30 = vector.load %arg6[%c0_20, %c0_21] : memref<1x1xf32, #tpu.memory_space<vmem>>, vector<1x1xf32>
      %cst_22 = arith.constant 8.000000e+00 : f32
      %31 = vector.broadcast %cst_22 : f32 to vector<1x1xf32>
      %32 = arith.mulf %31, %29 : vector<1x1xf32>
      %33 = arith.addf %30, %32 : vector<1x1xf32>
      %c0_23 = arith.constant 0 : index
      %c0_24 = arith.constant 0 : index
      %34 = vector.load %arg6[%c0_23, %c0_24] : memref<1x1xf32, #tpu.memory_space<vmem>>, vector<1x1xf32>
      tpu.vector_store %arg6[%c0_23, %c0_24], %33 {strides = array<i32>} : memref<1x1xf32, #tpu.memory_space<vmem>>, vector<1x1xf32>,
    } else {
    }
    return
  }
  func.func @transform_0(%arg0: i32) -> (i32, i32) {
    %c0_i32 = arith.constant 0 : i32
    %c0_i32_0 = arith.constant 0 : i32
    return %arg0, %c0_i32 : i32, i32
  }
  func.func @transform_1(%arg0: i32) -> (i32, i32) {
    %c0_i32 = arith.constant 0 : i32
    %c0_i32_0 = arith.constant 0 : i32
    %c0_i32_1 = arith.constant 0 : i32
    return %c0_i32, %c0_i32_0 : i32, i32
  }
  func.func @transform_2(%arg0: i32) -> (i32, i32) {
    %c0_i32 = arith.constant 0 : i32
    %c0_i32_0 = arith.constant 0 : i32
    %c0_i32_1 = arith.constant 0 : i32
    return %c0_i32, %c0_i32_0 : i32, i32
  }
  func.func @transform_3(%arg0: i32) -> (i32, i32) {
    %c0_i32 = arith.constant 0 : i32
    %c0_i32_0 = arith.constant 0 : i32
    %c0_i32_1 = arith.constant 0 : i32
    return %c0_i32, %c0_i32_0 : i32, i32
  }
  func.func @transform_4(%arg0: i32) -> (i32, i32) {
    %c0_i32 = arith.constant 0 : i32
    %c0_i32_0 = arith.constant 0 : i32
    %c0_i32_1 = arith.constant 0 : i32
    return %c0_i32, %c0_i32_0 : i32, i32
  }
  func.func @transform_5(%arg0: i32) -> (i32, i32) {
    %c0_i32 = arith.constant 0 : i32
    %c0_i32_0 = arith.constant 0 : i32
    %c0_i32_1 = arith.constant 0 : i32
    return %c0_i32, %c0_i32_0 : i32, i32
  }
}

</mosaic_0001>

<bundles_post_ra>
// kernel: tpu_custom_call.1
= control target key start
LH: loop header
LB: loop body
LE: loop exit
PB: predicated region body
PF: predicated region fallthrough
CT: control target
= control target key end

     0   :  { %s727_s0 = inlined_call_operand.vmem [shape: f32[8,512], index: 0, kind: input, shape index: {}]   ;;  %s728_s1 = inlined_call_operand.vmem [shape: f32[512,64], index: 1, kind: input, shape index: {}]   ;;  %s729_s2 = inlined_call_operand.vmem [shape: f32[1,64], index: 2, kind: input, shape index: {}]   ;;  %s730_s3 = inlined_call_operand.vmem [shape: f32[1,64], index: 3, kind: input, shape index: {}]   ;;  %s731_s4 = inlined_call_operand.<no memory space> [shape: f32[1,1], index: 4, kind: input, shape index: {}]   ;;  %s732_s5 = inlined_call_operand.hbm [shape: f32[1,1], index: 5, kind: output, shape index: {}]  }
   0x1   :  { %v10_v0 = vstv %s731_s4 }
   0x2   :  { %11 = vst [vmem:[#allocation2] sm:$0x1] %v10_v0 }
   0x3   :  { %v49_v1 = vld [vmem:[%s728_s1 + $0x80] sm:$0xff]  ;;  %v50_v2 = vld [vmem:[%s728_s1 + $0x88] sm:$0xff]  ;;  %v51_v12 = vld [vmem:[%s728_s1 + $0x90] sm:$0xff] }
   0x4   :  { %v81_v3 = vld [vmem:[%s728_s1 + $0x180] sm:$0xff]  ;;  %v370_v4 = vpack.c.bf16 %v50_v2, %v49_v1  ;;  %v82_v5 = vld [vmem:[%s728_s1 + $0x188] sm:$0xff]  ;;  %v52_v14 = vld [vmem:[%s728_s1 + $0x98] sm:$0xff] }
   0x5   :  { %v33_v6 = vld [vmem:[%s728_s1] sm:$0xff]  ;;  %v34_v7 = vld [vmem:[%s728_s1 + $0x8] sm:$0xff]  ;;  %v402_v8 = vpack.c.bf16 %v82_v5, %v81_v3  ;;  %v83_v15 = vld [vmem:[%s728_s1 + $0x190] sm:$0xff]  ;;  %v374_v17 = vpack.c.bf16 %v52_v14, %v51_v12 }
   0x6   :  { %v372_v9 = vpack.c.bf16 %v34_v7, %v33_v6  ;;  %v65_v10 = vld [vmem:[%s728_s1 + $0x100] sm:$0xff]  ;;  %v66_v11 = vld [vmem:[%s728_s1 + $0x108] sm:$0xff]  ;;  %371 = vmatprep.subr.bf16.mxu0 %v370_v4  ;;  %v84_v16 = vld [vmem:[%s728_s1 + $0x198] sm:$0xff] }
   0x7   :  { %v404_v13 = vpack.c.bf16 %v66_v11, %v65_v10  ;;  %403 = vmatprep.subr.bf16.mxu1 %v402_v8  ;;  %v406_v18 = vpack.c.bf16 %v84_v16, %v83_v15  ;;  %v35_v19 = vld [vmem:[%s728_s1 + $0x10] sm:$0xff]  ;;  %v36_v20 = vld [vmem:[%s728_s1 + $0x18] sm:$0xff]  ;;  %v53_v24 = vld [vmem:[%s728_s1 + $0xa0] sm:$0xff] }
   0x8   :  { %373 = vmatpush3.bf16.msra.mxu0 %v372_v9  ;;  %v67_v21 = vld [vmem:[%s728_s1 + $0x110] sm:$0xff]  ;;  %v376_v22 = vpack.c.bf16 %v36_v20, %v35_v19  ;;  %v68_v23 = vld [vmem:[%s728_s1 + $0x118] sm:$0xff]  ;;  %v54_v25 = vld [vmem:[%s728_s1 + $0xa8] sm:$0xff] }
   0x9   :  { %405 = vmatpush3.bf16.msra.mxu1 %v404_v13  ;;  %375 = vmatprep.subr.bf16.mxu0 %v374_v17  ;;  %v408_v26 = vpack.c.bf16 %v68_v23, %v67_v21  ;;  %v378_v27 = vpack.c.bf16 %v54_v25, %v53_v24  ;;  %v85_v28 = vld [vmem:[%s728_s1 + $0x1a0] sm:$0xff]  ;;  %v86_v29 = vld [vmem:[%s728_s1 + $0x1a8] sm:$0xff]  ;;  %v55_v36 = vld [vmem:[%s728_s1 + $0xb0] sm:$0xff] }
   0xa   :  { %407 = vmatprep.subr.bf16.mxu1 %v406_v18  ;;  %v37_v30 = vld [vmem:[%s728_s1 + $0x20] sm:$0xff]  ;;  %v410_v31 = vpack.c.bf16 %v86_v29, %v85_v28  ;;  %v38_v32 = vld [vmem:[%s728_s1 + $0x28] sm:$0xff]  ;;  %v56_v37 = vld [vmem:[%s728_s1 + $0xb8] sm:$0xff] }
   0xb   :  { %v69_v33 = vld [vmem:[%s728_s1 + $0x120] sm:$0xff]  ;;  %v70_v34 = vld [vmem:[%s728_s1 + $0x128] sm:$0xff]  ;;  %v380_v35 = vpack.c.bf16 %v38_v32, %v37_v30  ;;  %v87_v38 = vld [vmem:[%s728_s1 + $0x1b0] sm:$0xff]  ;;  %v382_v40 = vpack.c.bf16 %v56_v37, %v55_v36 }
   0xc   :  { %377 = vmatpush3.bf16.msra.mxu0 %v376_v22  ;;  %v412_v39 = vpack.c.bf16 %v70_v34, %v69_v33  ;;  %v88_v41 = vld [vmem:[%s728_s1 + $0x1b8] sm:$0xff]  ;;  %v39_v42 = vld [vmem:[%s728_s1 + $0x30] sm:$0xff]  ;;  %v57_v47 = vld [vmem:[%s728_s1 + $0xc0] sm:$0xff] }
   0xd   :  { %409 = vmatpush3.bf16.msra.mxu1 %v408_v26  ;;  %379 = vmatprep.subr.bf16.mxu0 %v378_v27  ;;  %v40_v43 = vld [vmem:[%s728_s1 + $0x38] sm:$0xff]  ;;  %v414_v44 = vpack.c.bf16 %v88_v41, %v87_v38  ;;  %v71_v45 = vld [vmem:[%s728_s1 + $0x130] sm:$0xff]  ;;  %v58_v48 = vld [vmem:[%s728_s1 + $0xc8] sm:$0xff] }
   0xe   :  { %411 = vmatprep.subr.bf16.mxu1 %v410_v31  ;;  %v72_v46 = vld [vmem:[%s728_s1 + $0x138] sm:$0xff]  ;;  %v89_v49 = vld [vmem:[%s728_s1 + $0x1c0] sm:$0xff]  ;;  %v90_v50 = vld [vmem:[%s728_s1 + $0x1c8] sm:$0xff]  ;;  %v384_v51 = vpack.c.bf16 %v40_v43, %v39_v42  ;;  %v386_v53 = vpack.c.bf16 %v58_v48, %v57_v47 }
   0xf   :  { %v416_v52 = vpack.c.bf16 %v72_v46, %v71_v45  ;;  %v41_v54 = vld [vmem:[%s728_s1 + $0x40] sm:$0xff]  ;;  %v42_v55 = vld [vmem:[%s728_s1 + $0x48] sm:$0xff]  ;;  %v418_v57 = vpack.c.bf16 %v90_v50, %v89_v49  ;;  %v59_v59 = vld [vmem:[%s728_s1 + $0xd0] sm:$0xff] }
  0x10   :  { %381 = vmatpush3.bf16.msra.mxu0 %v380_v35  ;;  %v73_v56 = vld [vmem:[%s728_s1 + $0x140] sm:$0xff]  ;;  %v74_v58 = vld [vmem:[%s728_s1 + $0x148] sm:$0xff]  ;;  %v60_v60 = vld [vmem:[%s728_s1 + $0xd8] sm:$0xff]  ;;  %v388_v63 = vpack.c.bf16 %v42_v55, %v41_v54 }
  0x11   :  { %413 = vmatpush3.bf16.msra.mxu1 %v412_v39  ;;  %383 = vmatprep.subr.bf16.mxu0 %v382_v40  ;;  %v91_v61 = vld [vmem:[%s728_s1 + $0x1d0] sm:$0xff]  ;;  %v92_v62 = vld [vmem:[%s728_s1 + $0x1d8] sm:$0xff]  ;;  %v420_v0 = vpack.c.bf16 %v74_v58, %v73_v56  ;;  %v390_v1 = vpack.c.bf16 %v60_v60, %v59_v59  ;;  %v61_v7 = vld [vmem:[%s728_s1 + $0xe0] sm:$0xff] }
  0x12   :  { %415 = vmatprep.subr.bf16.mxu1 %v414_v44  ;;  %v43_v2 = vld [vmem:[%s728_s1 + $0x50] sm:$0xff]  ;;  %v44_v3 = vld [vmem:[%s728_s1 + $0x58] sm:$0xff]  ;;  %v422_v5 = vpack.c.bf16 %v92_v62, %v91_v61  ;;  %v62_v8 = vld [vmem:[%s728_s1 + $0xe8] sm:$0xff] }
  0x13   :  { %v75_v4 = vld [vmem:[%s728_s1 + $0x150] sm:$0xff]  ;;  %v76_v6 = vld [vmem:[%s728_s1 + $0x158] sm:$0xff]  ;;  %v93_v9 = vld [vmem:[%s728_s1 + $0x1e0] sm:$0xff]  ;;  %v392_v11 = vpack.c.bf16 %v44_v3, %v43_v2  ;;  %v394_v16 = vpack.c.bf16 %v62_v8, %v61_v7 }
  0x14   :  { %385 = vmatpush3.bf16.msra.mxu0 %v384_v51  ;;  %v94_v10 = vld [vmem:[%s728_s1 + $0x1e8] sm:$0xff]  ;;  %v45_v12 = vld [vmem:[%s728_s1 + $0x60] sm:$0xff]  ;;  %v424_v15 = vpack.c.bf16 %v76_v6, %v75_v4  ;;  %v32_v19 = vld [vmem:[%s727_s0 + $0x18] sm:$0xff] }
  0x15   :  { %417 = vmatpush3.bf16.msra.mxu1 %v416_v52  ;;  %387 = vmatprep.subr.bf16.mxu0 %v386_v53  ;;  %v46_v13 = vld [vmem:[%s728_s1 + $0x68] sm:$0xff]  ;;  %v77_v14 = vld [vmem:[%s728_s1 + $0x160] sm:$0xff]  ;;  %v426_v20 = vpack.c.bf16 %v94_v10, %v93_v9  ;;  %v63_v21 = vld [vmem:[%s728_s1 + $0xf0] sm:$0xff] }
  0x16   :  { %419 = vmatprep.subr.bf16.mxu1 %v418_v57  ;;  %v78_v17 = vld [vmem:[%s728_s1 + $0x168] sm:$0xff]  ;;  %v64_v22 = vld [vmem:[%s728_s1 + $0xf8] sm:$0xff] }
  0x17   :  { %v30_v18 = vld [vmem:[%s727_s0 + $0x8] sm:$0xff] }
  0x18   :  { %389 = vmatpush3.bf16.msra.mxu0 %v388_v63  ;;  %161 = vmatprep.mubr.f32.mxu0 %v30_v18 }
  0x19   :  { %421 = vmatpush3.bf16.msra.mxu1 %v420_v0  ;;  %391 = vmatprep.subr.bf16.mxu0 %v390_v1 }
  0x1a   :  { %423 = vmatprep.subr.bf16.mxu1 %v422_v5 }
  0x1b   :  { %12 = vsyncpa [#allocation4], 0  ;;  %v95_v23 = vld [vmem:[%s728_s1 + $0x1f0] sm:$0xff]  ;;  %v96_v24 = vld [vmem:[%s728_s1 + $0x1f8] sm:$0xff]  ;;  %231 = vmatprep.mubr.f32.mxu1 %v32_v19  ;;  %v396_v25 = vpack.c.bf16 %v46_v13, %v45_v12  ;;  %v428_v26 = vpack.c.bf16 %v78_v17, %v77_v14  ;;  %v398_v27 = vpack.c.bf16 %v64_v22, %v63_v21  ;;  %vm246_vm0 = vcmask 523264  }
  0x1c   :  { %393 = vmatpush3.bf16.msra.mxu0 %v392_v11  ;;  %v47_v28 = vld [vmem:[%s728_s1 + $0x70] sm:$0xff]  ;;  %v48_v29 = vld [vmem:[%s728_s1 + $0x78] sm:$0xff]  ;;  %v430_v30 = vpack.c.bf16 %v96_v24, %v95_v23  ;;  %v29_v35 = vld [vmem:[%s727_s0] sm:$0xff]  ;;  %vm267_vm1 = vcmask 516096   ;;  %vm27_vm2 = vcmask 0   ;;  %v464_v51 = vmov 0.0  }
  0x1d   :  { %425 = vmatpush3.bf16.msra.mxu1 %v424_v15  ;;  %395 = vmatprep.subr.bf16.mxu0 %v394_v16  ;;  %v79_v31 = vld [vmem:[%s728_s1 + $0x170] sm:$0xff]  ;;  %v80_v32 = vld [vmem:[%s728_s1 + $0x178] sm:$0xff]  ;;  %v400_v33 = vpack.c.bf16 %v48_v29, %v47_v28  ;;  %v299_v43 = vld [vmem:[%s730_s3] ss:$0 sm:$0xff]  ;;  %28 = vst.msk [vmem:[#allocation3] sm:$0x1] %vm27_vm2, %v464_v51 }
  0x1e   :  { %427 = vmatprep.subr.bf16.mxu1 %v426_v20  ;;  %v432_v34 = vpack.c.bf16 %v80_v32, %v79_v31  ;;  %v31_v36 = vld [vmem:[%s727_s0 + $0x10] sm:$0xff]  ;;  %v264_v44 = vld [vmem:[%s729_s2] sm:$0x1] }
  0x1f   :  { %v265_v45 = vld [vmem:[%s730_s3] sm:$0x1]  ;;  %s465_s3 = smov [#allocation3]  }
  0x20   :  { %397 = vmatpush3.bf16.msra.mxu0 %v396_v25  ;;  %v266_v48 = vmul.f32 %v265_v45, %v264_v44  ;;  %v279_v5 = vld [vmem:[#allocation2] sm:$0x1]  ;;  %s291_s30 = sshll.u32 %s465_s3, 4  ;;  %s292_s30 = int_to_ptr.vmem [resolvable:$true] %s291_s30 }
  0x21   :  { %429 = vmatpush3.bf16.msra.mxu1 %v428_v26  ;;  %399 = vmatprep.subr.bf16.mxu0 %v398_v27  ;;  %s440_s6 = scalar_lea.vmem %s292_s30, 16  ;;  %s444_s7 = scalar_lea.vmem %s292_s30, 32 }
  0x22   :  { %431 = vmatprep.subr.bf16.mxu1 %v430_v30  ;;  %v268_v50 = vsel %vm267_vm1, %v266_v48, 0.0  ;;  %p441_p0 = scmp.ne.s32.totalorder %s292_s30, %s440_s6  ;;  %p445_p1 = scmp.lt.s32.totalorder %s292_s30, %s292_s30 }
  0x23   :  { %p446_p2 = scmp.lt.s32.totalorder %s444_s7, %s440_s6 }
  0x24   :  { %401 = vmatpush3.bf16.msra.mxu0 %v400_v33  ;;  %v237_v2 = vld [vmem:[#allocation3] sm:$0x1] }
  0x25   :  { %433 = vmatpush3.bf16.msra.mxu1 %v432_v34  ;;  %p447_p3 = por %p446_p2, %p445_p1 }
  0x27   :  { %162 = vmatmul.mubr.f32.vlgmr.msra.gmra.mrb[0].mxu0 %v29_v35  ;;  %p448_p4 = pnand %p447_p3, %p441_p0 }
  0x28   :  { %232 = vmatmul.mubr.f32.vlgmr.msra.gmra.mrb[0].mxu1 %v31_v36 }
  0xfa   :  { %v332_v37 = vpop.f32.mrb[0].mxu0 }
  0xfb   :  { %v367_v38 = vpop.f32.mrb[0].mxu1  ;;  %v333_v39 = vpop.f32.mrb[1].mxu0 }
  0xfc   :  { %v334_v40 = vadd.f32 %v333_v39, %v332_v37  ;;  %v368_v41 = vpop.f32.mrb[1].mxu1 }
  0xfd   :  { %v369_v42 = vadd.f32 %v368_v41, %v367_v38 }
  0xff   :  { %v234_v46 = vadd.f32 %v369_v42, %v334_v40 }
 0x101   :  { %v245_v47 = vmul.f32 %v299_v43, %v234_v46 }
 0x103   :  { %v247_v49 = vsel %vm246_vm0, %v245_v47, 0.0 }
 0x104   :  { %248 = vadd.xlane.f32.xlu0 %v247_v49 }
 0x108   :  { %269 = vadd.xlane.f32.xlu0 %v268_v50 }
 0x191   :  { %v249_v52 = vpop.xlane.xlu0 %248 }
 0x192   :  { %v250_v53 = vrot.slane %v249_v52, 4 }
 0x194   :  { %v251_v54 = vadd.f32 %v250_v53, %v249_v52 }
 0x195   :  { %v270_v55 = vpop.xlane.xlu0 %269 }
 0x196   :  { %v252_v56 = vrot.slane %v251_v54, 2  ;;  %v271_v57 = vrot.slane %v270_v55, 4 }
 0x198   :  { %v272_v58 = vadd.f32 %v271_v57, %v270_v55  ;;  %v253_v59 = vadd.f32 %v252_v56, %v251_v54 }
 0x19a   :  { %v273_v60 = vrot.slane %v272_v58, 2  ;;  %v254_v61 = vrot.slane %v253_v59, 1 }
 0x19c   :  { %v274_v62 = vadd.f32 %v273_v60, %v272_v58  ;;  %v255_v63 = vadd.f32 %v254_v61, %v253_v59 }
 0x19e   :  { %434 = vpush %v255_v63  ;;  %v275_v0 = vrot.slane %v274_v62, 1 }
 0x1a0   :  { %v276_v1 = vadd.f32 %v275_v0, %v274_v62 }
 0x1a2   :  { %436 = vpush %v276_v1 }
 0x1cf   :  { %s435_s0 = spop %434 }
 0x1d0   :  { %v257_v3 = vstv %s435_s0 }
 0x1d1   :  { %v258_v4 = vadd.f32 %v257_v3, %v237_v2 }
 0x1d3   :  { %260 = vst.msk [vmem:[#allocation3] sm:$0x1] %vm27_vm2, %v258_v4  ;;  %s437_s2 = spop %436 }
 0x1d4   :  { %v278_v6 = vstv %s437_s2 }
 0x1d5   :  { %v280_v7 = vadd.f32 %v279_v5, %v278_v6 }
 0x1d7   :  { %v282_v8 = vmul.f32 8.0, %v280_v7 }
 0x1da   :  { %v281_v9 = vld [vmem:[#allocation3] sm:$0x1] }
 0x1db   :  { %v283_v10 = vadd.f32 %v282_v8, %v281_v9 }
 0x1dd   :  { %284 = vst.msk [vmem:[#allocation3] sm:$0x1] %vm27_vm2, %v283_v10 }
 0x1de   :  { %451 = shalt.err (!%p448_p4)
}
 0x1df   :  { %s452_s10 = scalar_lea.hbm %s732_s5, 16 }
 0x1e0   :  { %p453_p5 = scmp.ne.s32.totalorder %s732_s5, %s452_s10  ;;  %p456_p6 = scmp.lt.u32.totalorder %s452_s10, %s732_s5 }
 0x1e2   :  { %p458_p7 = pnand %p456_p6, %p453_p5 }
 0x1e4   :  { %461 = shalt.err (!%p458_p7)
}
 0x1e5   :  { %294 = dma.vmem_to_hbm [thread:$0]  %s292_s30, 16, %s732_s5, [#allocation4]  }
 0x1e6   :  { %462 = dma.done.wait [#allocation4], 16  }
 0x1e7   :  { %463 = vsyncadd [#allocation4], 4294967280 }
 0x1e8   :  { %298 = vsyncpa [#allocation4], 1 }

</bundles_post_ra>
